<compile_context>
chip_gen: v5e
topology: v5e:2x2
jax: 0.10.0
libtpu: 0.0.40
codegen_flags: <defaults>
</compile_context>

<pallas_src>
import functools
import math

import jax
import jax.numpy as jnp
from jax.experimental import pallas as pl
from jax.experimental.pallas import tpu as pltpu


# ---------------------------------------------------------------------------
# lgamma via Lanczos approximation (valid for z > 0, which holds for all
# arguments used by the ZINB loss: disp+eps, x+1, x+disp+eps).
# The partial-fraction series  c0 + sum_i c_i/(zm1+i)  is folded into a single
# rational  c0 + N(zm1)/D(zm1)  (coefficients precomputed in float64 at import
# time; N and D are all-positive so f32 Horner has no cancellation).
# ---------------------------------------------------------------------------
_LANCZOS_G = 7.0
_LANCZOS_COEF = (
    0.99999999999980993,
    676.5203681218851,
    -1259.1392167224028,
    771.32342877765313,
    -176.61502916214059,
    12.507343278686905,
    -0.13857109526572012,
    9.9843695780195716e-6,
    1.5056327351493116e-7,
)
_HALF_LOG_2PI = 0.5 * math.log(2.0 * math.pi)
# Constant part of lgamma(disp+eps)+lgamma(x+1)-lgamma(x+disp+eps):
# the three "0.5*log(2pi)" terms give +0.5*log(2pi); the three "-t" terms give
# -( (a+6.5) + (b+6.5) - (c+6.5) ) = -(a+b-c) - 6.5 = -7.5  since a+b-c == 1.
_T1_CONST = _HALF_LOG_2PI - (_LANCZOS_G + 0.5)
# Clamp for the rational argument: keeps the degree-8 denominator << f32 max.
_LGAMMA_RATIONAL_CLAMP = 3.0e4


def _poly_mul(a, b):
    out = [0.0] * (len(a) + len(b) - 1)
    for i, ai in enumerate(a):
        for j, bj in enumerate(b):
            out[i + j] += ai * bj
    return out


def _poly_add(a, b):
    n = max(len(a), len(b))
    a = list(a) + [0.0] * (n - len(a))
    b = list(b) + [0.0] * (n - len(b))
    return [u + v for u, v in zip(a, b)]


def _partial_fraction_to_rational(indices):
    """sum_{i in indices} c_i / (t + i)  ->  (P(t), Q(t)) coeffs, low->high order."""
    den = [1.0]
    for i in indices:
        den = _poly_mul(den, [float(i), 1.0])
    num = [0.0]
    for i in indices:
        term = [1.0]
        for j in indices:
            if j != i:
                term = _poly_mul(term, [float(j), 1.0])
        num = _poly_add(num, [_LANCZOS_COEF[i] * c for c in term])
    return num, den


# Two all-positive rational pieces, then fold into a single rational
# N/D = P1/Q1 + P2/Q2  with  N = P1*Q2 + P2*Q1 (deg 7),  D = Q1*Q2 (deg 8).
# All coefficients of P1, P2, Q1, Q2 are positive, hence N, D are all-positive.
_P1, _Q1 = _partial_fraction_to_rational((1, 2, 3, 4))
_P2, _Q2 = _partial_fraction_to_rational((5, 6, 7, 8))
_SNUM = tuple(_poly_add(_poly_mul(_P1, _Q2), _poly_mul(_P2, _Q1)))
_SDEN = tuple(_poly_mul(_Q1, _Q2))


def _poly_eval(coeffs, t):
    """Horner evaluation; coeffs are Python floats low->high, t is an f32 array."""
    acc = coeffs[-1]
    for c in coeffs[-2::-1]:
        acc = acc * t + c
    return acc


def _lgamma_pieces(z):
    """For z > 0 return ((z-0.5)*log(z+6.5), s) so that
    lgamma(z) = 0.5*log(2pi) + first - (z+6.5) + log(s).
    Cost: 1 log + 1 divide on the EUP (the divide is the single rational)."""
    zm1 = z - 1.0
    t = zm1 + (_LANCZOS_G + 0.5)            # t = z + 6.5 > 6.5
    u = jnp.minimum(zm1, _LGAMMA_RATIONAL_CLAMP)
    s = _LANCZOS_COEF[0] + _poly_eval(_SNUM, u) / _poly_eval(_SDEN, u)
    return (zm1 + 0.5) * jnp.log(t), s


# ---------------------------------------------------------------------------
# Kernel. Grid = (n_parallel, k_steps):
#   * axis 0 ("parallel") splits row-tiles across TensorCores (v7x megacore),
#   * axis 1 ("arbitrary") is the reduction over row-tiles within a partial.
# The output block (tm, G) is indexed only by the parallel axis, so it stays
# resident in VMEM across the reduction axis and is used directly as the
# elementwise accumulator (zeroed at k == 0). The wrapper does the final sum.
# ---------------------------------------------------------------------------
def _zinb_kernel(x_ref, mean_ref, disp_ref, pi_ref, sf_ref, out_ref, *,
                 ridge_lambda, n_valid_rows, tm, k_steps, mask_rows):
    k = pl.program_id(1)

    @pl.when(k == 0)
    def _():
        out_ref[...] = jnp.zeros_like(out_ref)

    eps = 1e-10
    x = x_ref[...].astype(jnp.float32)
    disp = disp_ref[...].astype(jnp.float32)
    pi = pi_ref[...].astype(jnp.float32)
    sf = sf_ref[...].astype(jnp.float32)
    mean = mean_ref[...].astype(jnp.float32) * sf          # (tm,1) broadcast over G

    # Shared logarithms (EUP):
    ld = jnp.log(disp + eps)            # log(disp + eps)
    ldme = jnp.log(disp + mean + eps)   # log(disp + mean + eps)
    lme = jnp.log(mean + eps)           # log(mean + eps)

    # t1 = lgamma(disp+eps) + lgamma(x+1) - lgamma(x+disp+eps), fused Lanczos:
    la, sa = _lgamma_pieces(disp + eps)
    lb, sb = _lgamma_pieces(x + 1.0)
    lc, sc = _lgamma_pieces(x + disp + eps)
    t1 = _T1_CONST + la + lb - lc + jnp.log(sa * sb / sc)

    # t2 = (disp+x)*log(1+mean/(disp+eps)) + x*(log(disp+eps)-log(mean+eps))
    #    = (disp+x)*(ldme-ld)            + x*(ld - lme)
    t2 = (disp + x) * (ldme - ld) + x * (ld - lme)
    nb_case = t1 + t2 - jnp.log(1.0 - pi + eps)

    # zero_nb = (disp/(disp+mean+eps))**disp  ==  exp(disp*(log(disp) - ldme))
    # (log(disp+eps) vs log(disp): relative error <= eps/disp, negligible)
    zero_nb = jnp.exp(disp * (ld - ldme))
    zero_case = -jnp.log(pi + (1.0 - pi) * zero_nb + eps)

    result = jnp.where(x <= 1e-08, zero_case, nb_case)
    if ridge_lambda > 0.0:
        result = result + ridge_lambda * (pi * pi)

    if mask_rows:
        # Zero out contributions from rows padded past the true N.
        rt = pl.program_id(0) * k_steps + k
        row = jax.lax.broadcasted_iota(jnp.int32, result.shape, 0) + rt * tm
        result = jnp.where(row < n_valid_rows, result, 0.0)

    out_ref[...] += result


_TARGET_BLOCK_BYTES = 1 << 20  # ~1 MiB per (tm, G) f32 block (safe on 64 MiB v7x VMEM)


def _round_up(a, b):
    return -(-a // b) * b


def _auto_tm(G):
    tm = _TARGET_BLOCK_BYTES // (4 * G)
    return max(8, (tm // 8) * 8)


def _pad_rows(a, pad, value):
    return jnp.pad(a, ((0, pad),) + ((0, 0),) * (a.ndim - 1), constant_values=value)


def zinb_loss(x, mean, disp, pi, scale_factor, *, ridge_lambda=0.0, tm=None):
    """Pallas TPU implementation of ZINBLoss.forward. Returns a scalar f32."""
    N, G = x.shape
    assert mean.shape == (N, G) and disp.shape == (N, G) and pi.shape == (N, G)
    assert scale_factor.shape == (N, 1)

    if tm is None:
        tm = _auto_tm(G)
    tm = max(8, (int(tm) // 8) * 8)
    tm = min(tm, _round_up(N, 8))

    n_rows = _round_up(N, tm)
    pad = n_rows - N
    if pad:
        # Pad with benign values; padded rows are masked to 0 inside the kernel.
        x = _pad_rows(x, pad, 1.0)
        mean = _pad_rows(mean, pad, 1.0)
        disp = _pad_rows(disp, pad, 1.0)
        pi = _pad_rows(pi, pad, 0.5)
        scale_factor = _pad_rows(scale_factor, pad, 1.0)

    tiles = n_rows // tm
    n_par = 2 if (tiles >= 2 and tiles % 2 == 0) else 1   # use both TCs on v7x
    k_steps = tiles // n_par

    kernel = functools.partial(
        _zinb_kernel,
        ridge_lambda=float(ridge_lambda),
        n_valid_rows=N,
        tm=tm,
        k_steps=k_steps,
        mask_rows=(pad != 0),
    )

    row_spec = pl.BlockSpec((tm, G), lambda p, k: (p * k_steps + k, 0))
    sf_spec = pl.BlockSpec((tm, 1), lambda p, k: (p * k_steps + k, 0))
    out_spec = pl.BlockSpec((tm, G), lambda p, k: (p, 0))   # resident across k

    partials = pl.pallas_call(
        kernel,
        out_shape=jax.ShapeDtypeStruct((n_par * tm, G), jnp.float32),
        grid_spec=pltpu.PrefetchScalarGridSpec(
            num_scalar_prefetch=0,
            grid=(n_par, k_steps),
            in_specs=[row_spec, row_spec, row_spec, row_spec, sf_spec],
            out_specs=out_spec,
        ),
        compiler_params=pltpu.CompilerParams(
            dimension_semantics=("parallel", "arbitrary"),
            vmem_limit_bytes=32 * 1024 * 1024,
        ),
    )(x, mean, disp, pi, scale_factor)

    # Final reduction + mean in the wrapper (lane-dense partials, one XLA reduce).
    return jnp.sum(partials) / (N * G)


# ---------------------------------------------------------------------------
# Pure-JAX reference (mirror of the PyTorch module) for a sanity check.
# ---------------------------------------------------------------------------
def zinb_loss_ref(x, mean, disp, pi, scale_factor, ridge_lambda=0.0):
    eps = 1e-10
    mean = mean * scale_factor
    lg = jax.scipy.special.gammaln
    t1 = lg(disp + eps) + lg(x + 1.0) - lg(x + disp + eps)
    t2 = (disp + x) * jnp.log(1.0 + mean / (disp + eps)) + x * (
        jnp.log(disp + eps) - jnp.log(mean + eps)
    )
    nb_final = t1 + t2
    nb_case = nb_final - jnp.log(1.0 - pi + eps)
    zero_nb = jnp.power(disp / (disp + mean + eps), disp)
    zero_case = -jnp.log(pi + (1.0 - pi) * zero_nb + eps)
    result = jnp.where(x <= 1e-08, zero_case, nb_case)
    if ridge_lambda > 0:
        result = result + ridge_lambda * jnp.square(pi)
    return jnp.mean(result)


if __name__ == "__main__":
    def make_inputs(key, N, G):
        k1, k2, k3, k4, k5 = jax.random.split(key, 5)
        x = jax.random.poisson(k1, lam=1.5, shape=(N, G)).astype(jnp.float32)
        mean = jnp.exp(0.5 * jax.random.normal(k2, (N, G))).astype(jnp.float32)
        disp = jax.random.uniform(k3, (N, G), minval=0.5, maxval=2.0).astype(jnp.float32)
        pi = jax.random.uniform(k4, (N, G), minval=0.05, maxval=0.9).astype(jnp.float32)
        sf = jax.random.uniform(k5, (N, 1), minval=0.5, maxval=1.5).astype(jnp.float32)
        return x, mean, disp, pi, sf

    def check(out, ref, name):
        out = float(jax.block_until_ready(out))
        ref = float(ref)
        assert math.isfinite(out), f"{name}: non-finite loss"
        assert abs(out - ref) <= 2e-3 + 2e-3 * abs(ref), (
            f"{name}: mismatch kernel={out} ref={ref}"
        )

    key = jax.random.PRNGKey(0)
    ka, kb, kc = jax.random.split(key, 3)

    # Config A: multi-tile, dual partial accumulators (parallel axis = 2), no padding.
    xa, ma, da, pa, sa = make_inputs(ka, 64, 256)
    out_a = zinb_loss(xa, ma, da, pa, sa, ridge_lambda=0.0, tm=8)
    check(out_a, zinb_loss_ref(xa, ma, da, pa, sa, 0.0), "A")

    # Config B: ragged row count -> padding + in-kernel row mask, ridge term active.
    xb, mb, db, pb, sb = make_inputs(kb, 50, 256)
    out_b = zinb_loss(xb, mb, db, pb, sb, ridge_lambda=0.1, tm=16)
    check(out_b, zinb_loss_ref(xb, mb, db, pb, sb, 0.1), "B")

    # Config C: auto tile size (single tile covers all rows).
    xc, mc, dc, pc, sc = make_inputs(kc, 64, 256)
    out_c = zinb_loss(xc, mc, dc, pc, sc, ridge_lambda=0.0)
    check(out_c, zinb_loss_ref(xc, mc, dc, pc, sc, 0.0), "C")

    print("KERNEL_OK")
</pallas_src>

<mosaic_0001>
module attributes {stable_mosaic.version = 11 : i64} {
  func.func @_zinb_kernel(%arg0: i32, %arg1: i32, %arg2: memref<8x256xf32, #tpu.memory_space<vmem>>, %arg3: memref<8x256xf32, #tpu.memory_space<vmem>>, %arg4: memref<8x256xf32, #tpu.memory_space<vmem>>, %arg5: memref<8x256xf32, #tpu.memory_space<vmem>>, %arg6: memref<8x1xf32, #tpu.memory_space<vmem>>, %arg7: memref<8x256xf32, #tpu.memory_space<vmem>>) attributes {dimension_semantics = [#tpu.dimension_semantics<parallel>, #tpu.dimension_semantics<arbitrary>], iteration_bounds = array<i64: 2, 4>, scalar_prefetch = 0 : i64, scratch_operands = 0 : i64, tpu.core_type = #tpu.core_type<tc>, window_params = [{transform_indices = @transform_0, window_bounds = array<i64: 8, 256>}, {transform_indices = @transform_1, window_bounds = array<i64: 8, 256>}, {transform_indices = @transform_2, window_bounds = array<i64: 8, 256>}, {transform_indices = @transform_3, window_bounds = array<i64: 8, 256>}, {transform_indices = @transform_4, window_bounds = array<i64: 8, 1>}, {transform_indices = @transform_5, window_bounds = array<i64: 8, 256>}]} {
    %c0_i32 = arith.constant 0 : i32
    %0 = arith.cmpi eq, %arg1, %c0_i32 : i32
    %1 = arith.extui %0 : i1 to i32
    %c0_i32_0 = arith.constant 0 : i32
    %2 = arith.cmpi ne, %1, %c0_i32_0 : i32
    scf.if %2 {
      %cst_92 = arith.constant 0.000000e+00 : f32
      %246 = vector.broadcast %cst_92 : f32 to vector<8x256xf32>
      %c0_93 = arith.constant 0 : index
      %c0_94 = arith.constant 0 : index
      %247 = vector.load %arg7[%c0_93, %c0_94] : memref<8x256xf32, #tpu.memory_space<vmem>>, vector<8x256xf32>
      tpu.vector_store %arg7[%c0_93, %c0_94], %246 {strides = array<i32>} : memref<8x256xf32, #tpu.memory_space<vmem>>, vector<8x256xf32>,
    } else {
    }
    %c0 = arith.constant 0 : index
    %c0_1 = arith.constant 0 : index
    %3 = vector.load %arg2[%c0, %c0_1] : memref<8x256xf32, #tpu.memory_space<vmem>>, vector<8x256xf32>
    %c0_2 = arith.constant 0 : index
    %c0_3 = arith.constant 0 : index
    %4 = vector.load %arg4[%c0_2, %c0_3] : memref<8x256xf32, #tpu.memory_space<vmem>>, vector<8x256xf32>
    %c0_4 = arith.constant 0 : index
    %c0_5 = arith.constant 0 : index
    %5 = vector.load %arg5[%c0_4, %c0_5] : memref<8x256xf32, #tpu.memory_space<vmem>>, vector<8x256xf32>
    %c0_6 = arith.constant 0 : index
    %c0_7 = arith.constant 0 : index
    %6 = vector.load %arg6[%c0_6, %c0_7] : memref<8x1xf32, #tpu.memory_space<vmem>>, vector<8x1xf32>
    %c0_8 = arith.constant 0 : index
    %c0_9 = arith.constant 0 : index
    %7 = vector.load %arg3[%c0_8, %c0_9] : memref<8x256xf32, #tpu.memory_space<vmem>>, vector<8x256xf32>
    %8 = vector.broadcast %6 : vector<8x1xf32> to vector<8x256xf32>
    %9 = arith.mulf %7, %8 : vector<8x256xf32>
    %cst = arith.constant 1.000000e-10 : f32
    %10 = vector.broadcast %cst : f32 to vector<8x256xf32>
    %11 = arith.addf %4, %10 : vector<8x256xf32>
    %12 = math.log %11 : vector<8x256xf32>
    %13 = arith.addf %4, %9 : vector<8x256xf32>
    %cst_10 = arith.constant 1.000000e-10 : f32
    %14 = vector.broadcast %cst_10 : f32 to vector<8x256xf32>
    %15 = arith.addf %13, %14 : vector<8x256xf32>
    %16 = math.log %15 : vector<8x256xf32>
    %cst_11 = arith.constant 1.000000e-10 : f32
    %17 = vector.broadcast %cst_11 : f32 to vector<8x256xf32>
    %18 = arith.addf %9, %17 : vector<8x256xf32>
    %19 = math.log %18 : vector<8x256xf32>
    %cst_12 = arith.constant 1.000000e-10 : f32
    %20 = vector.broadcast %cst_12 : f32 to vector<8x256xf32>
    %21 = arith.addf %4, %20 : vector<8x256xf32>
    %cst_13 = arith.constant 1.000000e+00 : f32
    %22 = vector.broadcast %cst_13 : f32 to vector<8x256xf32>
    %23 = arith.subf %21, %22 : vector<8x256xf32>
    %cst_14 = arith.constant 7.500000e+00 : f32
    %24 = vector.broadcast %cst_14 : f32 to vector<8x256xf32>
    %25 = arith.addf %23, %24 : vector<8x256xf32>
    %cst_15 = arith.constant 3.000000e+04 : f32
    %26 = vector.broadcast %cst_15 : f32 to vector<8x256xf32>
    %27 = arith.minimumf %23, %26 : vector<8x256xf32>
    %cst_16 = arith.constant 24.458334 : f32
    %28 = vector.broadcast %cst_16 : f32 to vector<8x256xf32>
    %29 = arith.mulf %28, %27 : vector<8x256xf32>
    %cst_17 = arith.constant 1053.04248 : f32
    %30 = vector.broadcast %cst_17 : f32 to vector<8x256xf32>
    %31 = arith.addf %29, %30 : vector<8x256xf32>
    %32 = arith.mulf %31, %27 : vector<8x256xf32>
    %cst_18 = arith.constant 19629.5098 : f32
    %33 = vector.broadcast %cst_18 : f32 to vector<8x256xf32>
    %34 = arith.addf %32, %33 : vector<8x256xf32>
    %35 = arith.mulf %34, %27 : vector<8x256xf32>
    %cst_19 = arith.constant 205786.219 : f32
    %36 = vector.broadcast %cst_19 : f32 to vector<8x256xf32>
    %37 = arith.addf %35, %36 : vector<8x256xf32>
    %38 = arith.mulf %37, %27 : vector<8x256xf32>
    %cst_20 = arith.constant 1312212.25 : f32
    %39 = vector.broadcast %cst_20 : f32 to vector<8x256xf32>
    %40 = arith.addf %38, %39 : vector<8x256xf32>
    %41 = arith.mulf %40, %27 : vector<8x256xf32>
    %cst_21 = arith.constant 0x4A9B6B12 : f32
    %42 = vector.broadcast %cst_21 : f32 to vector<8x256xf32>
    %43 = arith.addf %41, %42 : vector<8x256xf32>
    %44 = arith.mulf %43, %27 : vector<8x256xf32>
    %cst_22 = arith.constant 0x4B29F141 : f32
    %45 = vector.broadcast %cst_22 : f32 to vector<8x256xf32>
    %46 = arith.addf %44, %45 : vector<8x256xf32>
    %47 = arith.mulf %46, %27 : vector<8x256xf32>
    %cst_23 = arith.constant 0x4B216D5A : f32
    %48 = vector.broadcast %cst_23 : f32 to vector<8x256xf32>
    %49 = arith.addf %47, %48 : vector<8x256xf32>
    %cst_24 = arith.constant 1.000000e+00 : f32
    %50 = vector.broadcast %cst_24 : f32 to vector<8x256xf32>
    %51 = arith.mulf %50, %27 : vector<8x256xf32>
    %cst_25 = arith.constant 3.600000e+01 : f32
    %52 = vector.broadcast %cst_25 : f32 to vector<8x256xf32>
    %53 = arith.addf %51, %52 : vector<8x256xf32>
    %54 = arith.mulf %53, %27 : vector<8x256xf32>
    %cst_26 = arith.constant 5.460000e+02 : f32
    %55 = vector.broadcast %cst_26 : f32 to vector<8x256xf32>
    %56 = arith.addf %54, %55 : vector<8x256xf32>
    %57 = arith.mulf %56, %27 : vector<8x256xf32>
    %cst_27 = arith.constant 4.536000e+03 : f32
    %58 = vector.broadcast %cst_27 : f32 to vector<8x256xf32>
    %59 = arith.addf %57, %58 : vector<8x256xf32>
    %60 = arith.mulf %59, %27 : vector<8x256xf32>
    %cst_28 = arith.constant 2.244900e+04 : f32
    %61 = vector.broadcast %cst_28 : f32 to vector<8x256xf32>
    %62 = arith.addf %60, %61 : vector<8x256xf32>
    %63 = arith.mulf %62, %27 : vector<8x256xf32>
    %cst_29 = arith.constant 6.728400e+04 : f32
    %64 = vector.broadcast %cst_29 : f32 to vector<8x256xf32>
    %65 = arith.addf %63, %64 : vector<8x256xf32>
    %66 = arith.mulf %65, %27 : vector<8x256xf32>
    %cst_30 = arith.constant 1.181240e+05 : f32
    %67 = vector.broadcast %cst_30 : f32 to vector<8x256xf32>
    %68 = arith.addf %66, %67 : vector<8x256xf32>
    %69 = arith.mulf %68, %27 : vector<8x256xf32>
    %cst_31 = arith.constant 1.095840e+05 : f32
    %70 = vector.broadcast %cst_31 : f32 to vector<8x256xf32>
    %71 = arith.addf %69, %70 : vector<8x256xf32>
    %72 = arith.mulf %71, %27 : vector<8x256xf32>
    %cst_32 = arith.constant 4.032000e+04 : f32
    %73 = vector.broadcast %cst_32 : f32 to vector<8x256xf32>
    %74 = arith.addf %72, %73 : vector<8x256xf32>
    %75 = arith.divf %49, %74 : vector<8x256xf32>
    %cst_33 = arith.constant 1.000000e+00 : f32
    %76 = vector.broadcast %cst_33 : f32 to vector<8x256xf32>
    %77 = arith.addf %76, %75 : vector<8x256xf32>
    %cst_34 = arith.constant 5.000000e-01 : f32
    %78 = vector.broadcast %cst_34 : f32 to vector<8x256xf32>
    %79 = arith.addf %23, %78 : vector<8x256xf32>
    %80 = math.log %25 : vector<8x256xf32>
    %81 = arith.mulf %79, %80 : vector<8x256xf32>
    %cst_35 = arith.constant 1.000000e+00 : f32
    %82 = vector.broadcast %cst_35 : f32 to vector<8x256xf32>
    %83 = arith.addf %3, %82 : vector<8x256xf32>
    %cst_36 = arith.constant 1.000000e+00 : f32
    %84 = vector.broadcast %cst_36 : f32 to vector<8x256xf32>
    %85 = arith.subf %83, %84 : vector<8x256xf32>
    %cst_37 = arith.constant 7.500000e+00 : f32
    %86 = vector.broadcast %cst_37 : f32 to vector<8x256xf32>
    %87 = arith.addf %85, %86 : vector<8x256xf32>
    %cst_38 = arith.constant 3.000000e+04 : f32
    %88 = vector.broadcast %cst_38 : f32 to vector<8x256xf32>
    %89 = arith.minimumf %85, %88 : vector<8x256xf32>
    %cst_39 = arith.constant 24.458334 : f32
    %90 = vector.broadcast %cst_39 : f32 to vector<8x256xf32>
    %91 = arith.mulf %90, %89 : vector<8x256xf32>
    %cst_40 = arith.constant 1053.04248 : f32
    %92 = vector.broadcast %cst_40 : f32 to vector<8x256xf32>
    %93 = arith.addf %91, %92 : vector<8x256xf32>
    %94 = arith.mulf %93, %89 : vector<8x256xf32>
    %cst_41 = arith.constant 19629.5098 : f32
    %95 = vector.broadcast %cst_41 : f32 to vector<8x256xf32>
    %96 = arith.addf %94, %95 : vector<8x256xf32>
    %97 = arith.mulf %96, %89 : vector<8x256xf32>
    %cst_42 = arith.constant 205786.219 : f32
    %98 = vector.broadcast %cst_42 : f32 to vector<8x256xf32>
    %99 = arith.addf %97, %98 : vector<8x256xf32>
    %100 = arith.mulf %99, %89 : vector<8x256xf32>
    %cst_43 = arith.constant 1312212.25 : f32
    %101 = vector.broadcast %cst_43 : f32 to vector<8x256xf32>
    %102 = arith.addf %100, %101 : vector<8x256xf32>
    %103 = arith.mulf %102, %89 : vector<8x256xf32>
    %cst_44 = arith.constant 0x4A9B6B12 : f32
    %104 = vector.broadcast %cst_44 : f32 to vector<8x256xf32>
    %105 = arith.addf %103, %104 : vector<8x256xf32>
    %106 = arith.mulf %105, %89 : vector<8x256xf32>
    %cst_45 = arith.constant 0x4B29F141 : f32
    %107 = vector.broadcast %cst_45 : f32 to vector<8x256xf32>
    %108 = arith.addf %106, %107 : vector<8x256xf32>
    %109 = arith.mulf %108, %89 : vector<8x256xf32>
    %cst_46 = arith.constant 0x4B216D5A : f32
    %110 = vector.broadcast %cst_46 : f32 to vector<8x256xf32>
    %111 = arith.addf %109, %110 : vector<8x256xf32>
    %cst_47 = arith.constant 1.000000e+00 : f32
    %112 = vector.broadcast %cst_47 : f32 to vector<8x256xf32>
    %113 = arith.mulf %112, %89 : vector<8x256xf32>
    %cst_48 = arith.constant 3.600000e+01 : f32
    %114 = vector.broadcast %cst_48 : f32 to vector<8x256xf32>
    %115 = arith.addf %113, %114 : vector<8x256xf32>
    %116 = arith.mulf %115, %89 : vector<8x256xf32>
    %cst_49 = arith.constant 5.460000e+02 : f32
    %117 = vector.broadcast %cst_49 : f32 to vector<8x256xf32>
    %118 = arith.addf %116, %117 : vector<8x256xf32>
    %119 = arith.mulf %118, %89 : vector<8x256xf32>
    %cst_50 = arith.constant 4.536000e+03 : f32
    %120 = vector.broadcast %cst_50 : f32 to vector<8x256xf32>
    %121 = arith.addf %119, %120 : vector<8x256xf32>
    %122 = arith.mulf %121, %89 : vector<8x256xf32>
    %cst_51 = arith.constant 2.244900e+04 : f32
    %123 = vector.broadcast %cst_51 : f32 to vector<8x256xf32>
    %124 = arith.addf %122, %123 : vector<8x256xf32>
    %125 = arith.mulf %124, %89 : vector<8x256xf32>
    %cst_52 = arith.constant 6.728400e+04 : f32
    %126 = vector.broadcast %cst_52 : f32 to vector<8x256xf32>
    %127 = arith.addf %125, %126 : vector<8x256xf32>
    %128 = arith.mulf %127, %89 : vector<8x256xf32>
    %cst_53 = arith.constant 1.181240e+05 : f32
    %129 = vector.broadcast %cst_53 : f32 to vector<8x256xf32>
    %130 = arith.addf %128, %129 : vector<8x256xf32>
    %131 = arith.mulf %130, %89 : vector<8x256xf32>
    %cst_54 = arith.constant 1.095840e+05 : f32
    %132 = vector.broadcast %cst_54 : f32 to vector<8x256xf32>
    %133 = arith.addf %131, %132 : vector<8x256xf32>
    %134 = arith.mulf %133, %89 : vector<8x256xf32>
    %cst_55 = arith.constant 4.032000e+04 : f32
    %135 = vector.broadcast %cst_55 : f32 to vector<8x256xf32>
    %136 = arith.addf %134, %135 : vector<8x256xf32>
    %137 = arith.divf %111, %136 : vector<8x256xf32>
    %cst_56 = arith.constant 1.000000e+00 : f32
    %138 = vector.broadcast %cst_56 : f32 to vector<8x256xf32>
    %139 = arith.addf %138, %137 : vector<8x256xf32>
    %cst_57 = arith.constant 5.000000e-01 : f32
    %140 = vector.broadcast %cst_57 : f32 to vector<8x256xf32>
    %141 = arith.addf %85, %140 : vector<8x256xf32>
    %142 = math.log %87 : vector<8x256xf32>
    %143 = arith.mulf %141, %142 : vector<8x256xf32>
    %144 = arith.addf %3, %4 : vector<8x256xf32>
    %cst_58 = arith.constant 1.000000e-10 : f32
    %145 = vector.broadcast %cst_58 : f32 to vector<8x256xf32>
    %146 = arith.addf %144, %145 : vector<8x256xf32>
    %cst_59 = arith.constant 1.000000e+00 : f32
    %147 = vector.broadcast %cst_59 : f32 to vector<8x256xf32>
    %148 = arith.subf %146, %147 : vector<8x256xf32>
    %cst_60 = arith.constant 7.500000e+00 : f32
    %149 = vector.broadcast %cst_60 : f32 to vector<8x256xf32>
    %150 = arith.addf %148, %149 : vector<8x256xf32>
    %cst_61 = arith.constant 3.000000e+04 : f32
    %151 = vector.broadcast %cst_61 : f32 to vector<8x256xf32>
    %152 = arith.minimumf %148, %151 : vector<8x256xf32>
    %cst_62 = arith.constant 24.458334 : f32
    %153 = vector.broadcast %cst_62 : f32 to vector<8x256xf32>
    %154 = arith.mulf %153, %152 : vector<8x256xf32>
    %cst_63 = arith.constant 1053.04248 : f32
    %155 = vector.broadcast %cst_63 : f32 to vector<8x256xf32>
    %156 = arith.addf %154, %155 : vector<8x256xf32>
    %157 = arith.mulf %156, %152 : vector<8x256xf32>
    %cst_64 = arith.constant 19629.5098 : f32
    %158 = vector.broadcast %cst_64 : f32 to vector<8x256xf32>
    %159 = arith.addf %157, %158 : vector<8x256xf32>
    %160 = arith.mulf %159, %152 : vector<8x256xf32>
    %cst_65 = arith.constant 205786.219 : f32
    %161 = vector.broadcast %cst_65 : f32 to vector<8x256xf32>
    %162 = arith.addf %160, %161 : vector<8x256xf32>
    %163 = arith.mulf %162, %152 : vector<8x256xf32>
    %cst_66 = arith.constant 1312212.25 : f32
    %164 = vector.broadcast %cst_66 : f32 to vector<8x256xf32>
    %165 = arith.addf %163, %164 : vector<8x256xf32>
    %166 = arith.mulf %165, %152 : vector<8x256xf32>
    %cst_67 = arith.constant 0x4A9B6B12 : f32
    %167 = vector.broadcast %cst_67 : f32 to vector<8x256xf32>
    %168 = arith.addf %166, %167 : vector<8x256xf32>
    %169 = arith.mulf %168, %152 : vector<8x256xf32>
    %cst_68 = arith.constant 0x4B29F141 : f32
    %170 = vector.broadcast %cst_68 : f32 to vector<8x256xf32>
    %171 = arith.addf %169, %170 : vector<8x256xf32>
    %172 = arith.mulf %171, %152 : vector<8x256xf32>
    %cst_69 = arith.constant 0x4B216D5A : f32
    %173 = vector.broadcast %cst_69 : f32 to vector<8x256xf32>
    %174 = arith.addf %172, %173 : vector<8x256xf32>
    %cst_70 = arith.constant 1.000000e+00 : f32
    %175 = vector.broadcast %cst_70 : f32 to vector<8x256xf32>
    %176 = arith.mulf %175, %152 : vector<8x256xf32>
    %cst_71 = arith.constant 3.600000e+01 : f32
    %177 = vector.broadcast %cst_71 : f32 to vector<8x256xf32>
    %178 = arith.addf %176, %177 : vector<8x256xf32>
    %179 = arith.mulf %178, %152 : vector<8x256xf32>
    %cst_72 = arith.constant 5.460000e+02 : f32
    %180 = vector.broadcast %cst_72 : f32 to vector<8x256xf32>
    %181 = arith.addf %179, %180 : vector<8x256xf32>
    %182 = arith.mulf %181, %152 : vector<8x256xf32>
    %cst_73 = arith.constant 4.536000e+03 : f32
    %183 = vector.broadcast %cst_73 : f32 to vector<8x256xf32>
    %184 = arith.addf %182, %183 : vector<8x256xf32>
    %185 = arith.mulf %184, %152 : vector<8x256xf32>
    %cst_74 = arith.constant 2.244900e+04 : f32
    %186 = vector.broadcast %cst_74 : f32 to vector<8x256xf32>
    %187 = arith.addf %185, %186 : vector<8x256xf32>
    %188 = arith.mulf %187, %152 : vector<8x256xf32>
    %cst_75 = arith.constant 6.728400e+04 : f32
    %189 = vector.broadcast %cst_75 : f32 to vector<8x256xf32>
    %190 = arith.addf %188, %189 : vector<8x256xf32>
    %191 = arith.mulf %190, %152 : vector<8x256xf32>
    %cst_76 = arith.constant 1.181240e+05 : f32
    %192 = vector.broadcast %cst_76 : f32 to vector<8x256xf32>
    %193 = arith.addf %191, %192 : vector<8x256xf32>
    %194 = arith.mulf %193, %152 : vector<8x256xf32>
    %cst_77 = arith.constant 1.095840e+05 : f32
    %195 = vector.broadcast %cst_77 : f32 to vector<8x256xf32>
    %196 = arith.addf %194, %195 : vector<8x256xf32>
    %197 = arith.mulf %196, %152 : vector<8x256xf32>
    %cst_78 = arith.constant 4.032000e+04 : f32
    %198 = vector.broadcast %cst_78 : f32 to vector<8x256xf32>
    %199 = arith.addf %197, %198 : vector<8x256xf32>
    %200 = arith.divf %174, %199 : vector<8x256xf32>
    %cst_79 = arith.constant 1.000000e+00 : f32
    %201 = vector.broadcast %cst_79 : f32 to vector<8x256xf32>
    %202 = arith.addf %201, %200 : vector<8x256xf32>
    %cst_80 = arith.constant 5.000000e-01 : f32
    %203 = vector.broadcast %cst_80 : f32 to vector<8x256xf32>
    %204 = arith.addf %148, %203 : vector<8x256xf32>
    %205 = math.log %150 : vector<8x256xf32>
    %206 = arith.mulf %204, %205 : vector<8x256xf32>
    %cst_81 = arith.constant -6.58106136 : f32
    %207 = vector.broadcast %cst_81 : f32 to vector<8x256xf32>
    %208 = arith.addf %207, %81 : vector<8x256xf32>
    %209 = arith.addf %208, %143 : vector<8x256xf32>
    %210 = arith.subf %209, %206 : vector<8x256xf32>
    %211 = arith.mulf %77, %139 : vector<8x256xf32>
    %212 = arith.divf %211, %202 : vector<8x256xf32>
    %213 = math.log %212 : vector<8x256xf32>
    %214 = arith.addf %210, %213 : vector<8x256xf32>
    %215 = arith.addf %4, %3 : vector<8x256xf32>
    %216 = arith.subf %16, %12 : vector<8x256xf32>
    %217 = arith.mulf %215, %216 : vector<8x256xf32>
    %218 = arith.subf %12, %19 : vector<8x256xf32>
    %219 = arith.mulf %3, %218 : vector<8x256xf32>
    %220 = arith.addf %217, %219 : vector<8x256xf32>
    %221 = arith.addf %214, %220 : vector<8x256xf32>
    %cst_82 = arith.constant 1.000000e+00 : f32
    %222 = vector.broadcast %cst_82 : f32 to vector<8x256xf32>
    %223 = arith.subf %222, %5 : vector<8x256xf32>
    %cst_83 = arith.constant 1.000000e-10 : f32
    %224 = vector.broadcast %cst_83 : f32 to vector<8x256xf32>
    %225 = arith.addf %223, %224 : vector<8x256xf32>
    %226 = math.log %225 : vector<8x256xf32>
    %227 = arith.subf %221, %226 : vector<8x256xf32>
    %228 = arith.subf %12, %16 : vector<8x256xf32>
    %229 = arith.mulf %4, %228 : vector<8x256xf32>
    %230 = math.exp %229 : vector<8x256xf32>
    %cst_84 = arith.constant 1.000000e+00 : f32
    %231 = vector.broadcast %cst_84 : f32 to vector<8x256xf32>
    %232 = arith.subf %231, %5 : vector<8x256xf32>
    %233 = arith.mulf %232, %230 : vector<8x256xf32>
    %234 = arith.addf %5, %233 : vector<8x256xf32>
    %cst_85 = arith.constant 1.000000e-10 : f32
    %235 = vector.broadcast %cst_85 : f32 to vector<8x256xf32>
    %236 = arith.addf %234, %235 : vector<8x256xf32>
    %237 = math.log %236 : vector<8x256xf32>
    %cst_86 = arith.constant 0.000000e+00 : f32
    %238 = vector.broadcast %cst_86 : f32 to vector<8x256xf32>
    %239 = arith.subf %238, %237 : vector<8x256xf32>
    %cst_87 = arith.constant 9.99999993E-9 : f32
    %240 = vector.broadcast %cst_87 : f32 to vector<8x256xf32>
    %241 = arith.cmpf ole, %3, %240 : vector<8x256xf32>
    %242 = arith.select %241, %239, %227 : vector<8x256xi1>, vector<8x256xf32>
    %c0_88 = arith.constant 0 : index
    %c0_89 = arith.constant 0 : index
    %243 = vector.load %arg7[%c0_88, %c0_89] : memref<8x256xf32, #tpu.memory_space<vmem>>, vector<8x256xf32>
    %244 = arith.addf %243, %242 : vector<8x256xf32>
    %c0_90 = arith.constant 0 : index
    %c0_91 = arith.constant 0 : index
    %245 = vector.load %arg7[%c0_90, %c0_91] : memref<8x256xf32, #tpu.memory_space<vmem>>, vector<8x256xf32>
    tpu.vector_store %arg7[%c0_90, %c0_91], %244 {strides = array<i32>} : memref<8x256xf32, #tpu.memory_space<vmem>>, vector<8x256xf32>,
    return
  }
  func.func @transform_0(%arg0: i32, %arg1: i32) -> (i32, i32) {
    %c4_i32 = arith.constant 4 : i32
    %0 = arith.muli %arg0, %c4_i32 : i32
    %1 = arith.addi %0, %arg1 : i32
    %c0_i32 = arith.constant 0 : i32
    %c0_i32_0 = arith.constant 0 : i32
    return %1, %c0_i32 : i32, i32
  }
  func.func @transform_1(%arg0: i32, %arg1: i32) -> (i32, i32) {
    %c4_i32 = arith.constant 4 : i32
    %0 = arith.muli %arg0, %c4_i32 : i32
    %1 = arith.addi %0, %arg1 : i32
    %c0_i32 = arith.constant 0 : i32
    %c0_i32_0 = arith.constant 0 : i32
    return %1, %c0_i32 : i32, i32
  }
  func.func @transform_2(%arg0: i32, %arg1: i32) -> (i32, i32) {
    %c4_i32 = arith.constant 4 : i32
    %0 = arith.muli %arg0, %c4_i32 : i32
    %1 = arith.addi %0, %arg1 : i32
    %c0_i32 = arith.constant 0 : i32
    %c0_i32_0 = arith.constant 0 : i32
    return %1, %c0_i32 : i32, i32
  }
  func.func @transform_3(%arg0: i32, %arg1: i32) -> (i32, i32) {
    %c4_i32 = arith.constant 4 : i32
    %0 = arith.muli %arg0, %c4_i32 : i32
    %1 = arith.addi %0, %arg1 : i32
    %c0_i32 = arith.constant 0 : i32
    %c0_i32_0 = arith.constant 0 : i32
    return %1, %c0_i32 : i32, i32
  }
  func.func @transform_4(%arg0: i32, %arg1: i32) -> (i32, i32) {
    %c4_i32 = arith.constant 4 : i32
    %0 = arith.muli %arg0, %c4_i32 : i32
    %1 = arith.addi %0, %arg1 : i32
    %c0_i32 = arith.constant 0 : i32
    %c0_i32_0 = arith.constant 0 : i32
    return %1, %c0_i32 : i32, i32
  }
  func.func @transform_5(%arg0: i32, %arg1: i32) -> (i32, i32) {
    %c0_i32 = arith.constant 0 : i32
    %c0_i32_0 = arith.constant 0 : i32
    return %arg0, %c0_i32 : i32, i32
  }
}

</mosaic_0001>

<bundles_post_ra>
// kernel: tpu_custom_call.1
= control target key start
LH: loop header
LB: loop body
LE: loop exit
PB: predicated region body
PF: predicated region fallthrough
CT: control target
= control target key end

     0   :  { %s2236_s0 = inlined_call_operand.hbm [shape: f32[64,256], index: 0, kind: input, shape index: {}]   ;;  %s2237_s1 = inlined_call_operand.hbm [shape: f32[64,256], index: 1, kind: input, shape index: {}]   ;;  %s2238_s2 = inlined_call_operand.hbm [shape: f32[64,256], index: 2, kind: input, shape index: {}]   ;;  %s2239_s3 = inlined_call_operand.hbm [shape: f32[64,256], index: 3, kind: input, shape index: {}]   ;;  %s2240_s4 = inlined_call_operand.vmem [shape: f32[64,1], index: 4, kind: input, shape index: {}]   ;;  %s2241_s5 = inlined_call_operand.hbm [shape: f32[16,256], index: 5, kind: output, shape index: {}]  }
   0x1   :  { %2254 = sst [smem:[#allocation27_spill]] %s2236_s0 }
   0x2   :  { %2255 = sst [smem:[#allocation28_spill]] %s2237_s1 }
   0x3   :  { %10 = vsyncpa [#allocation3], 0 }
   0x4   :  { %12 = vsyncpa [#allocation3 + $0x1], 0 }
   0x5   :  { %13 = vsyncpa [#allocation6], 0 }
   0x6   :  { %15 = vsyncpa [#allocation6 + $0x1], 0 }
   0x7   :  { %16 = vsyncpa [#allocation9], 0 }
   0x8   :  { %18 = vsyncpa [#allocation9 + $0x1], 0 }
   0x9   :  { %19 = vsyncpa [#allocation4], 0 }
   0xa   :  { %21 = vsyncpa [#allocation4 + $0x1], 0  ;;  %s1590_s18 = smov 0   ;;  %s1592_s19 = smov 0  }
   0xb   :  { %s1594_s20 = smov 0   ;;  %s1596_s21 = smov 0  }
   0xc   :  { %s1598_s22 = smov 0   ;;  %s1600_s23 = smov 0  }
   0xd   :  { %s1602_s24 = smov 0   ;;  %s1604_s25 = smov 0  }
   0xe   :  { %s1606_s26 = smov 0   ;;  %s1608_s27 = smov 0  }
   0xf   :  { %s1610_s28 = smov 0  }
  0x10 LB: > { %2256 = sst [smem:[#allocation15_spill]] %s1516_s18  ;;  %s1644_s29 = sadd.s32 4294967295, %s1556_s28   ;;  %s1556_s28 = sphi %s1610_s28, %s27_s28   ;;  %s1552_s27 = sphi %s1608_s27, %s2306_s27   ;;  %s1548_s26 = sphi %s1606_s26, %s2305_s26   ;;  %s1544_s25 = sphi %s1604_s25, %s2304_s25   ;;  %s1540_s24 = sphi %s1602_s24, %s2303_s24   ;;  %s1536_s23 = sphi %s1600_s23, %s2311_s23   ;;  %s1532_s22 = sphi %s1598_s22, %s2310_s22   ;;  %s1528_s21 = sphi %s1596_s21, %s2309_s21   ;;  %s1524_s20 = sphi %s1594_s20, %s2300_s20   ;;  %s1520_s19 = sphi %s1592_s19, %s2308_s19   ;;  %s1516_s18 = sphi %s1590_s18, %s2307_s18  }
  0x11   : > { %2257 = sst [smem:[#allocation16_spill]] %s1524_s20  ;;  %s36_s6 = sadd.s32 1, %s1548_s26 }
  0x12   : > { %2258 = sst [smem:[#allocation17_spill]] %s1536_s23  ;;  %s39_s7 = sadd.s32 1, %s1552_s27 }
  0x13   : > { %2259 = sst [smem:[#allocation18_spill]] %s1548_s26  ;;  %p37_p0 = scmp.ge.s32.totalorder %s36_s6, 4 }
  0x14   : > { %2260 = sst [smem:[#allocation19_spill]] %s1552_s27  ;;  %s1077_s8 = sshll.u32 %s1552_s27, 2 }
  0x15   : > { %2261 = sst [smem:[#allocation20_spill]] %s1556_s28  ;;  %s1651_s9 = sadd.s32 %s1548_s26, %s1077_s8 }
  0x16   : > { %s50_s10 = sadd.s32 1, %s1536_s23  ;;  %s2313_s6 = smov (%p37_p0, %s36_s6), 0 }
  0x17   : > { %2262 = sst [smem:[#allocation21_spill]] %s2313_s6  ;;  %s2315_s7 = smov (!%p37_p0, %s39_s7), %s1552_s27 }
  0x18   : > { %p57_p1 = scmp.ne.s32.totalorder %s1536_s23, %s1532_s22  ;;  %p58_p2 = scmp.eq.s32.totalorder %s1556_s28, 0 }
  0x19   : > { %p41_p3 = scmp.ge.s32.totalorder %s2315_s7, 2  ;;  %p63_p4 = scmp.ne.s32.totalorder %s1532_s22, %s1528_s21 }
  0x1a   : > { %p1661_p5 = por %p58_p2, %p57_p1  ;;  %p64_p6 = scmp.eq.s32.totalorder %s1644_s29, 0 }
  0x1b   : > { %s2317_s7 = smov (%p41_p3, %s2315_s7), 0  ;;  %s196_s13 = sadd.s32 1, %s1524_s20 }
  0x1c   : > { %2264 = sst [smem:[#allocation22_spill]] %s2317_s7  ;;  %p1668_p7 = por %p64_p6, %p63_p4 }
  0x1d   : > { %s1078_s14 = sshll.u32 %s2317_s7, 2  ;;  %s193_s15 = ssub.s32 %s1552_s27, %s2317_s7 }
  0x1e   : > { %s46_s16 = sadd.s32 %s1078_s14, %s2313_s6  ;;  %p194_p8 = scmp.eq.s32.totalorder %s193_s15, 0 }
  0x1f   : > { %s47_s17 = ssub.s32 %s1651_s9, %s46_s16  ;;  %p206_p9 = scmp.ne.s32.totalorder %s1524_s20, %s1520_s19 }
  0x20   : > { %p48_p10 = scmp.eq.s32.totalorder %s47_s17, 0  ;;  %p207_p11 = scmp.eq.s32.totalorder %s1644_s29, 7 }
  0x21   : > { %s1682_s21 = scalar_select %p194_p8, %s1524_s20, %s196_s13  }
  0x22   : > { %s1685_s8 = scalar_select %p48_p10, %s1536_s23, %s50_s10  }
  0x23   : > { %2266 = sst [smem:[#allocation23_spill]] %s1682_s21  ;;  %p1687_p12 = por %p207_p11, %p206_p9 }
  0x24   : > { %2267 = sst [smem:[#allocation24_spill]] %s1685_s8  ;;  %p212_p13 = scmp.ne.s32.totalorder %s1520_s19, %s1516_s18 }
  0x25   : > { %s2268_s30 = scalar_select %p1687_p12, 1, 0 }
  0x26   : > { %s2270_s7 = sadd.s32 4294967294, %s1556_s28   ;;  %p1157_p1 = scmp.lt.s32.totalorder %s1556_s28, 8 }
  0x27   : > { %2269 = sst [smem:[#allocation25_spill]] %s2268_s30  ;;  %p213_p0 = scmp.eq.s32.totalorder %s2270_s7, 7 }
  0x28   : > { %s1697_s14 = sand.u32 1, %s1536_s23   ;;  %s1707_s10 = sshll.u32 %s1651_s9, 4 }
  0x29   : > { %p1699_p2 = por %p213_p0, %p212_p13  ;;  %s1704_s13 = sshll.u32 %s1697_s14, 4 }
  0x2a   : > { %p1711_p3 = pnand %p1157_p1, %p1661_p5  ;;  %s255_s16 = sand.u32 1, %s1556_s28  }
  0x2b   : > { %s2271_s15 = scalar_select %p1699_p2, 1, 0 }
  0x2c   : > { %s2274_s1 = sld [smem:[#allocation28_spill]]  ;;  %s259_s26 = scalar_lea.vmem [#allocation5], %s1704_s13 }
  0x2d   : > { %2272 = sst [smem:[#allocation26_spill]] %s2271_s15  ;;  %s270_s8 = sshll.u32 %s259_s26, 4  ;;  %s271_s8 = int_to_ptr.vmem [resolvable:$true] %s270_s8 }
  0x2e   : > { %p1105_p4 = scmp.ge.s32.totalorder %s1556_s28, 1  ;;  %s256_s9 = scalar_lea.sflag [#allocation6], %s255_s16 }
  0x2f   : > { %p330_p5 = scmp.lt.s32.totalorder %s1556_s28, 9  ;;  %s2276_s0 = sld [smem:[#allocation27_spill]] }
  0x30   : > { %s234_s16 = scalar_lea.sflag [#allocation3], %s1697_s14  ;;  %s288_s20 = scalar_lea.hbm %s2238_s2, %s1707_s10 }
  0x31   : > { %p1725_p6 = pnand %p1105_p4, %p330_p5  ;;  %s281_s15 = scalar_lea.vmem [#allocation7], %s1704_s13 }
  0x32   : > { %s266_s27 = scalar_lea.hbm %s2274_s1, %s1707_s10  ;;  %s292_s18 = sshll.u32 %s281_s15, 4  ;;  %s293_s18 = int_to_ptr.vmem [resolvable:$true] %s292_s18 }
  0x33   : > { %s268_s23 = sshll.u32 %s266_s27, 4  ;;  %s237_s27 = scalar_lea.vmem [#allocation2], %s1704_s13  ;;  %s269_s23 = int_to_ptr.hbm [resolvable:$true] %s268_s23 }
  0x34   : > { %1146 = dma.hbm_to_vmem [thread:$0]  (!%p1711_p3), %s269_s23, 256, %s271_s8, %s256_s9  }
  0x35   : > { %s244_s26 = scalar_lea.hbm %s2276_s0, %s1707_s10  ;;  %s248_s1 = sshll.u32 %s237_s27, 4  ;;  %s249_s1 = int_to_ptr.vmem [resolvable:$true] %s248_s1 }
  0x36   : > { %s246_s21 = sshll.u32 %s244_s26, 4  ;;  %s290_s6 = sshll.u32 %s288_s20, 4  ;;  %s247_s21 = int_to_ptr.hbm [resolvable:$true] %s246_s21  ;;  %s291_s6 = int_to_ptr.hbm [resolvable:$true] %s290_s6 }
  0x37   : > { %1143 = dma.hbm_to_vmem [thread:$0]  (!%p1711_p3), %s247_s21, 256, %s249_s1, %s234_s16  }
  0x38   : > { %1149 = dma.hbm_to_vmem [thread:$0]  (!%p1711_p3), %s291_s6, 256, %s293_s18, %s256_s9  }
  0x39   : > { %s310_s27 = scalar_lea.hbm %s2239_s3, %s1707_s10  ;;  %s303_s28 = scalar_lea.vmem [#allocation8], %s1704_s13 }
  0x3a   : > { %s312_s0 = sshll.u32 %s310_s27, 4  ;;  %s314_s30 = sshll.u32 %s303_s28, 4  ;;  %s313_s0 = int_to_ptr.hbm [resolvable:$true] %s312_s0  ;;  %s315_s30 = int_to_ptr.vmem [resolvable:$true] %s314_s30 }
  0x3b   : > { %s300_s1 = scalar_lea.sflag [#allocation9], %s1697_s14  ;;  %334 = sbr.rel (%p1725_p6) target bundleno = 254 (0xfe), region = 40 }
  0x3c   : > { %1152 = dma.hbm_to_vmem [thread:$0]  (!%p1711_p3), %s313_s0, 256, %s315_s30, %s300_s1  }
  0x3d   : > { %s336_s20 = sand.u32 (!%p1725_p6), 1, %s1532_s22  }
  0x3e   : > { %s1755_s21 = sshll.u32 (!%p1725_p6), %s336_s20, 4  ;;  %s337_s18 = scalar_lea.sflag (!%p1725_p6), [#allocation3], %s336_s20 }
  0x3f   : > { %s340_s15 = scalar_lea.vmem (!%p1725_p6), [#allocation2], %s1755_s21 }
  0x40   : > { %1499 = dma.done.wait (%p1668_p7), %s337_s18, 256  }
  0x41   : > { %1501 = vsyncadd (%p1668_p7), %s337_s18, 4294967040  ;;  %s346_s0 = sand.u32 1, %s1644_s29   ;;  %s350_s30 = scalar_lea.vmem [#allocation5], %s1755_s21 }
  0x42   : > { %s347_s28 = scalar_lea.sflag [#allocation6], %s346_s0 }
  0x43   : > { %1503 = dma.done.wait (%p1668_p7), %s347_s28, 512  }
  0x44   : > { %1505 = vsyncadd (%p1668_p7), %s347_s28, 4294966784  ;;  %s360_s14 = scalar_lea.vmem [#allocation7], %s1755_s21  ;;  %s367_s13 = scalar_lea.sflag [#allocation9], %s336_s20 }
  0x45   : > { %s370_s10 = scalar_lea.vmem [#allocation8], %s1755_s21 }
  0x46   : > { %1507 = dma.done.wait (%p1668_p7), %s367_s13, 256  }
  0x47   : > { %1509 = vsyncadd (%p1668_p7), %s367_s13, 4294967040  ;;  %s416_s29 = sand.u32 1, %s1520_s19   ;;  %s1111_s7 = sshll.u32 %s1544_s25, 2 }
  0x48   : > { %s1110_s9 = sshll.u32 %s416_s29, 4  ;;  %s428_s11 = sadd.s32 %s1540_s24, %s1111_s7 }
  0x49   : > { %p429_p8 = scmp.lt.s32.totalorder %s428_s11, 7  ;;  %s1782_s17 = scalar_lea.vmem [#allocation10], %s1110_s9 }
  0x4a   : > { %p1113_p7 = scmp.ne.s32.totalorder %s1540_s24, 0 }
  0x4b   : > { %s2319_s11 = smov (!%p429_p8, %s428_s11), 7 }
  0x4c   : > { %s1112_s16 = sshll.u32 %s2319_s11, 3  ;;  %438 = sbr.rel (%p1113_p7) target bundleno = 84 (0x54), region = 60 }
  0x4d   : > { %s432_s6 = scalar_lea.vmem %s2240_s4, %s1112_s16 }
  0x51   : > { %v1558_v0 = vmov 0.0  }
  0x52   : > { %439 = vst [vmem:[%s1782_s17] sm:$0xff] %v1558_v0 }
  0x53   : > { %440 = vst [vmem:[%s1782_s17 + $0x8] sm:$0xff] %v1558_v0 }
  0x54 PF: > { %v447_v1 = vld [vmem:[%s432_s6] sm:$0xff]  ;;  %v1559_v2 = vmov 0   ;;  %v1799_v6 = vld [vmem:[%s340_s15 + $0x8] sm:$0xff]  ;;  %s1129_s24 = sshll.u32 %s1544_s25, 4  ;;  %s905_s1 = sshll.u32 %s1782_s17, 4  ;;  %s906_s1 = int_to_ptr.vmem [resolvable:$true] %s905_s1 }
  0x55   : > { %1249 = vset.pattern.permute.xlu0 %v1559_v2  ;;  %v1789_v3 = vld [vmem:[%s340_s15] sm:$0xff]  ;;  %v1801_v7 = vld [vmem:[%s360_s14 + $0x8] sm:$0xff]  ;;  %v582_v21 = vadd.f32 1.0, %v1799_v6  ;;  %s903_s27 = scalar_lea.hbm %s2241_s5, %s1129_s24  ;;  %s892_s21 = scalar_lea.sflag [#allocation4], %s416_s29 }
  0x56   : > { %452 = vperm.xlu0 %1249, %v447_v1   ;;  %v1791_v4 = vld [vmem:[%s360_s14] sm:$0xff]  ;;  %v1806_v9 = vadd.f32 %v1801_v7, %v1799_v6  ;;  %v1822_v17 = vadd.f32 1e-10, %v1801_v7  ;;  %v581_v20 = vadd.f32 1.0, %v1789_v3  ;;  %s907_s20 = sshll.u32 %s903_s27, 4  ;;  %s908_s20 = int_to_ptr.hbm [resolvable:$true] %s907_s20 }
  0x57   : > { %v1795_v5 = vadd.f32 %v1791_v4, %v1789_v3  ;;  %v1819_v16 = vadd.f32 1e-10, %v1791_v4  ;;  %v1837_v25 = vadd.f32 -1.0, %v582_v21  ;;  %s1440_s18 = sshra.s32 %s908_s20, 4  ;;  %s1441_s18 = int_to_ptr.hbm [resolvable:$true] %s1440_s18 }
  0x58   : > { %v690_v12 = vadd.f32 1e-10, %v1806_v9  ;;  %v1833_v23 = vadd.f32 -1.0, %v1822_v17  ;;  %v1835_v24 = vadd.f32 -1.0, %v581_v20  ;;  %s1442_s15 = scalar_lea.hbm %s1441_s18, 16  ;;  %p1447_p13 = scmp.lt.s32.totalorder %s1441_s18, %s2241_s5 }
  0x59   : > { %v689_v8 = vadd.f32 1e-10, %v1795_v5  ;;  %v1830_v22 = vadd.f32 -1.0, %v1819_v16  ;;  %v1851_v31 = vmin.f32 %v1837_v25, 30000.0  ;;  %p1443_p9 = scmp.ne.s32.totalorder %s1441_s18, %s1442_s15 }
  0x5a   : > { %v1815_v14 = vadd.f32 -1.0, %v690_v12  ;;  %v1845_v29 = vmin.f32 %v1833_v23, 30000.0  ;;  %v1848_v30 = vmin.f32 %v1835_v24, 30000.0 }
  0x5b   : > { %v1808_v10 = vadd.f32 -1.0, %v689_v8  ;;  %v1842_v28 = vmin.f32 %v1830_v22, 30000.0  ;;  %v618_v35 = vadd.f32 36.0, %v1851_v31  ;;  %p1444_p10 = pnand %p1443_p9, %p1687_p12 }
  0x5c   : > { %v1825_v18 = vmin.f32 %v1815_v14, 30000.0  ;;  %v512_v33 = vadd.f32 36.0, %v1845_v29  ;;  %v617_v34 = vadd.f32 36.0, %v1848_v30 }
  0x5d   : > { %v1811_v11 = vmin.f32 %v1808_v10, 30000.0  ;;  %v511_v32 = vadd.f32 36.0, %v1842_v28  ;;  %v620_v41 = vmul.f32 %v618_v35, %v1851_v31  ;;  %p1445_p11 = pneg %p1444_p10 }
  0x5e   : > { %v726_v26 = vadd.f32 36.0, %v1825_v18  ;;  %v514_v39 = vmul.f32 %v512_v33, %v1845_v29  ;;  %v619_v40 = vmul.f32 %v617_v34, %v1848_v30  ;;  %v698_v1 = vmul.f32 24.458334, %v1825_v18 }
  0x5f   : > { %v725_v13 = vadd.f32 36.0, %v1811_v11  ;;  %v513_v38 = vmul.f32 %v511_v32, %v1842_v28  ;;  %v622_v45 = vadd.f32 546.0, %v620_v41  ;;  %v697_v61 = vmul.f32 24.458334, %v1811_v11 }
  0x60   : > { %v728_v36 = vmul.f32 %v726_v26, %v1825_v18  ;;  %v516_v43 = vadd.f32 546.0, %v514_v39  ;;  %v621_v44 = vadd.f32 546.0, %v619_v40  ;;  %v484_v39 = vmul.f32 24.458334, %v1845_v29 }
  0x61   : > { %v727_v15 = vmul.f32 %v725_v13, %v1811_v11  ;;  %v515_v42 = vadd.f32 546.0, %v513_v38  ;;  %v624_v51 = vmul.f32 %v622_v45, %v1851_v31  ;;  %v699_v26 = vadd.f32 1053.0425, %v697_v61 }
  0x62   : > { %v730_v46 = vadd.f32 546.0, %v728_v36  ;;  %v518_v49 = vmul.f32 %v516_v43, %v1845_v29  ;;  %v623_v50 = vmul.f32 %v621_v44, %v1848_v30  ;;  %v483_v38 = vmul.f32 24.458334, %v1842_v28 }
  0x63   : > { %v729_v19 = vadd.f32 546.0, %v727_v15  ;;  %v517_v48 = vmul.f32 %v515_v42, %v1842_v28  ;;  %v626_v59 = vadd.f32 4536.0, %v624_v51  ;;  %v589_v40 = vmul.f32 24.458334, %v1848_v30 }
  0x64   : > { %v520_v53 = vadd.f32 4536.0, %v518_v49  ;;  %v625_v54 = vadd.f32 4536.0, %v623_v50  ;;  %v732_v55 = vmul.f32 %v730_v46, %v1825_v18  ;;  %v590_v43 = vmul.f32 24.458334, %v1851_v31 }
  0x65   : > { %v731_v27 = vmul.f32 %v729_v19, %v1811_v11  ;;  %v519_v52 = vadd.f32 4536.0, %v517_v48  ;;  %v628_v15 = vmul.f32 %v626_v59, %v1851_v31  ;;  %v701_v44 = vmul.f32 %v699_v26, %v1811_v11 }
  0x66   : > { %v522_v58 = vmul.f32 %v520_v53, %v1845_v29  ;;  %v627_v60 = vmul.f32 %v625_v54, %v1848_v30  ;;  %v734_v2 = vadd.f32 4536.0, %v732_v55  ;;  %v485_v45 = vadd.f32 1053.0425, %v483_v38 }
  0x67   : > { %v733_v37 = vadd.f32 4536.0, %v731_v27  ;;  %v521_v57 = vmul.f32 %v519_v52, %v1842_v28  ;;  %v700_v27 = vadd.f32 1053.0425, %v698_v1  ;;  %v630_v36 = vadd.f32 22449.0, %v628_v15 }
  0x68   : > { %v524_v63 = vadd.f32 22449.0, %v522_v58  ;;  %v629_v0 = vadd.f32 22449.0, %v627_v60  ;;  %v736_v32 = vmul.f32 %v734_v2, %v1825_v18  ;;  %v486_v46 = vadd.f32 1053.0425, %v484_v39 }
  0x69   : > { %v735_v47 = vmul.f32 %v733_v37, %v1811_v11  ;;  %v523_v62 = vadd.f32 22449.0, %v521_v57  ;;  %v592_v49 = vadd.f32 1053.0425, %v590_v43  ;;  %v487_v52 = vmul.f32 %v485_v45, %v1842_v28 }
  0x6a   : > { %v526_v13 = vmul.f32 %v524_v63, %v1845_v29  ;;  %v631_v19 = vmul.f32 %v629_v0, %v1848_v30  ;;  %v738_v50 = vadd.f32 22449.0, %v736_v32  ;;  %v488_v53 = vmul.f32 %v486_v46, %v1845_v29 }
  0x6b   : > { %v737_v56 = vadd.f32 22449.0, %v735_v47  ;;  %v525_v12 = vmul.f32 %v523_v62, %v1842_v28  ;;  %v591_v47 = vadd.f32 1053.0425, %v589_v40  ;;  %v632_v55 = vmul.f32 %v630_v36, %v1851_v31 }
  0x6c   : > { %v528_v21 = vadd.f32 67284.0, %v526_v13  ;;  %v633_v37 = vadd.f32 67284.0, %v631_v19  ;;  %v702_v58 = vmul.f32 %v700_v27, %v1825_v18  ;;  %v703_v59 = vadd.f32 19629.51, %v701_v44 }
  0x6d   : > { %v739_v8 = vmul.f32 %v737_v56, %v1811_v11  ;;  %v527_v20 = vadd.f32 67284.0, %v525_v12  ;;  %v593_v54 = vmul.f32 %v591_v47, %v1848_v30  ;;  %v489_v60 = vadd.f32 19629.51, %v487_v52 }
  0x6e   : > { %v530_v35 = vmul.f32 %v528_v21, %v1845_v29  ;;  %v635_v57 = vmul.f32 %v633_v37, %v1848_v30  ;;  %v490_v61 = vadd.f32 19629.51, %v488_v53  ;;  %v594_v63 = vmul.f32 %v592_v49, %v1851_v31 }
  0x6f   : > { %v741_v33 = vadd.f32 67284.0, %v739_v8  ;;  %v529_v34 = vmul.f32 %v527_v20, %v1842_v28  ;;  %v595_v0 = vadd.f32 19629.51, %v593_v54  ;;  %v740_v1 = vmul.f32 %v738_v50, %v1825_v18 }
  0x70   : > { %v532_v42 = vadd.f32 118124.0, %v530_v35  ;;  %v491_v8 = vmul.f32 %v489_v60, %v1842_v28  ;;  %v492_v12 = vmul.f32 %v490_v61, %v1845_v29  ;;  %v634_v15 = vadd.f32 67284.0, %v632_v55 }
  0x71   : > { %v531_v41 = vadd.f32 118124.0, %v529_v34  ;;  %v743_v51 = vmul.f32 %v741_v33, %v1811_v11  ;;  %v637_v19 = vadd.f32 118124.0, %v635_v57  ;;  %v704_v20 = vadd.f32 19629.51, %v702_v58 }
  0x72   : > { %v534_v62 = vmul.f32 %v532_v42, %v1845_v29  ;;  %v493_v21 = vadd.f32 205786.22, %v491_v8  ;;  %v596_v27 = vadd.f32 19629.51, %v594_v63  ;;  %v705_v32 = vmul.f32 %v703_v59, %v1811_v11 }
  0x73   : > { %v533_v48 = vmul.f32 %v531_v41, %v1842_v28  ;;  %v745_v2 = vadd.f32 118124.0, %v743_v51  ;;  %v597_v33 = vmul.f32 %v595_v0, %v1848_v30  ;;  %v742_v34 = vadd.f32 67284.0, %v740_v1 }
  0x74   : > { %v536_v26 = vadd.f32 109584.0, %v534_v62  ;;  %v494_v35 = vadd.f32 205786.22, %v492_v12  ;;  %v636_v37 = vmul.f32 %v634_v15, %v1851_v31  ;;  %v639_v39 = vmul.f32 %v637_v19, %v1848_v30 }
  0x75   : > { %v535_v56 = vadd.f32 109584.0, %v533_v48  ;;  %v747_v38 = vmul.f32 %v745_v2, %v1811_v11  ;;  %v706_v40 = vmul.f32 %v704_v20, %v1825_v18  ;;  %v495_v41 = vmul.f32 %v493_v21, %v1842_v28 }
  0x76   : > { %v538_v42 = vmul.f32 %v536_v26, %v1845_v29  ;;  %v598_v43 = vmul.f32 %v596_v27, %v1851_v31  ;;  %v707_v44 = vadd.f32 205786.22, %v705_v32  ;;  %v599_v45 = vadd.f32 205786.22, %v597_v33 }
  0x77   : > { %v537_v13 = vmul.f32 %v535_v56, %v1842_v28  ;;  %v744_v46 = vmul.f32 %v742_v34, %v1825_v18  ;;  %v496_v47 = vmul.f32 %v494_v35, %v1845_v29  ;;  %v638_v48 = vadd.f32 118124.0, %v636_v37 }
  0x78   : > { %v749_v49 = vadd.f32 109584.0, %v747_v38  ;;  %v641_v50 = vadd.f32 109584.0, %v639_v39  ;;  %v708_v51 = vadd.f32 205786.22, %v706_v40  ;;  %v709_v55 = vmul.f32 %v707_v44, %v1811_v11 }
  0x79   : > { %v1902_v36 = vadd.f32 40320.0, %v537_v13  ;;  %v497_v52 = vadd.f32 1312212.3, %v495_v41  ;;  %v1914_v53 = vadd.f32 40320.0, %v538_v42  ;;  %v600_v54 = vadd.f32 205786.22, %v598_v43 }
  0x7a   : > { %v601_v56 = vmul.f32 %v599_v45, %v1848_v30  ;;  %v498_v57 = vadd.f32 1312212.3, %v496_v47  ;;  %v640_v58 = vmul.f32 %v638_v48, %v1851_v31  ;;  %v746_v59 = vadd.f32 118124.0, %v744_v46 }
  0x7b   : > { %1250 = vrcp.f32 %v1902_v36  ;;  %v751_v60 = vmul.f32 %v749_v49, %v1811_v11  ;;  %v643_v61 = vmul.f32 %v641_v50, %v1848_v30  ;;  %v710_v62 = vmul.f32 %v708_v51, %v1825_v18 }
  0x7c   : > { %v499_v0 = vmul.f32 %v497_v52, %v1842_v28  ;;  %1252 = vrcp.f32 %v1914_v53  ;;  %v602_v1 = vmul.f32 %v600_v54, %v1851_v31  ;;  %v711_v2 = vadd.f32 1312212.3, %v709_v55 }
  0x7d   : > { %v603_v8 = vadd.f32 1312212.3, %v601_v56  ;;  %v500_v12 = vmul.f32 %v498_v57, %v1845_v29  ;;  %v642_v13 = vadd.f32 109584.0, %v640_v58  ;;  %v748_v15 = vmul.f32 %v746_v59, %v1825_v18 }
  0x7e   : > { %v1929_v19 = vadd.f32 40320.0, %v751_v60  ;;  %v1933_v21 = vadd.f32 40320.0, %v643_v61  ;;  %v501_v26 = vadd.f32 5092745.0, %v499_v0  ;;  %v604_v27 = vadd.f32 1312212.3, %v602_v1 }
  0x7f   : > { %v712_v32 = vadd.f32 1312212.3, %v710_v62  ;;  %v713_v33 = vmul.f32 %v711_v2, %v1811_v11  ;;  %v605_v34 = vmul.f32 %v603_v8, %v1848_v30  ;;  %v502_v37 = vadd.f32 5092745.0, %v500_v12 }
  0x80   : > { %v644_v38 = vmul.f32 %v642_v13, %v1851_v31  ;;  %v750_v39 = vadd.f32 109584.0, %v748_v15  ;;  %1254 = vrcp.f32 %v1929_v19  ;;  %v503_v41 = vmul.f32 %v501_v26, %v1842_v28 }
  0x81   : > { %v1922_v63 = vpop.eup %1250  ;;  %1256 = vrcp.f32 %v1933_v21  ;;  %v606_v42 = vmul.f32 %v604_v27, %v1851_v31  ;;  %v714_v43 = vmul.f32 %v712_v32, %v1825_v18  ;;  %v715_v44 = vadd.f32 5092745.0, %v713_v33 }
  0x82   : > { %v542_v20 = vmul.f32 %v1922_v63, %v1902_v36  ;;  %v1937_v35 = vpop.eup %1252  ;;  %v607_v46 = vadd.f32 5092745.0, %v605_v34  ;;  %v504_v47 = vmul.f32 %v502_v37, %v1845_v29  ;;  %v1948_v48 = vadd.f32 40320.0, %v644_v38 }
  0x83   : > { %v557_v45 = vmul.f32 %v1937_v35, %v1914_v53  ;;  %v752_v49 = vmul.f32 %v750_v39, %v1825_v18  ;;  %v505_v52 = vadd.f32 11137345.0, %v503_v41  ;;  %v608_v54 = vadd.f32 5092745.0, %v606_v42 }
  0x84   : > { %v543_v40 = vsub.f32 1.0, %v542_v20  ;;  %v716_v55 = vadd.f32 5092745.0, %v714_v43  ;;  %v717_v56 = vmul.f32 %v715_v44, %v1811_v11  ;;  %vm546_vm0 = vweird.f32 %v1902_v36 }
  0x85   : > { %vm547_vm1 = vweird.f32 %v1922_v63  ;;  %v558_v58 = vsub.f32 1.0, %v557_v45  ;;  %v609_v59 = vmul.f32 %v607_v46, %v1848_v30  ;;  %v506_v60 = vadd.f32 11137345.0, %v504_v47 }
  0x86   : > { %v544_v50 = vmul.f32 %v1922_v63, %v543_v40  ;;  %v1952_v51 = vpop.eup %1254  ;;  %v552_v61 = vand.u32 2147483648, %v1902_v36  ;;  %1258 = vrcp.f32 %v1948_v48  ;;  %v1962_v62 = vadd.f32 40320.0, %v752_v49  ;;  %vm1970_vm3 = vmor %vm546_vm0, %vm547_vm1 }
  0x87   : > { %v1955_v57 = vpop.eup %1256  ;;  %v550_v1 = vand.u32 2147483647, %v1902_v36  ;;  %v756_v2 = vmul.f32 %v1952_v51, %v1929_v19  ;;  %vm760_vm2 = vweird.f32 %v1929_v19  ;;  %v507_v8 = vmul.f32 %v505_v52, %v1842_v28 }
  0x88   : > { %v545_v0 = vadd.f32 %v1922_v63, %v544_v50  ;;  %v610_v13 = vmul.f32 %v608_v54, %v1851_v31  ;;  %v718_v15 = vmul.f32 %v716_v55, %v1825_v18  ;;  %v719_v20 = vadd.f32 11137345.0, %v717_v56 }
  0x89   : > { %1260 = vlog2.f32 %v1819_v16  ;;  %v559_v36 = vmul.f32 %v1937_v35, %v558_v58  ;;  %v611_v26 = vadd.f32 11137345.0, %v609_v59  ;;  %v648_v27 = vmul.f32 %v1955_v57, %v1933_v21 }
  0x8a   : > { %1262 = vlog2.f32 %v1822_v17  ;;  %v508_v28 = vmul.f32 %v506_v60, %v1845_v29  ;;  %v553_v32 = vor.u32 1.1754944e-38, %v552_v61  ;;  %v567_v33 = vand.u32 2147483648, %v1914_v53 }
  0x8b   : > { %v549_v34 = vsel %vm1970_vm3, %v1922_v63, %v545_v0  ;;  %vm551_vm4 = vcmp.eq.f32.partialorder %v550_v1, 8.507059e+37  ;;  %vm561_vm5 = vweird.f32 %v1914_v53  ;;  %vm562_vm6 = vweird.f32 %v1937_v35 }
  0x8c   : > { %v1988_v16 = vpop.eup %1258  ;;  %v479_v37 = vadd.f32 7.5, %v1830_v22  ;;  %v509_v38 = vadd.f32 10579290.0, %v507_v8  ;;  %v721_v17 = vmul.f32 %v719_v20, %v1811_v11  ;;  %v757_v29 = vsub.f32 1.0, %v756_v2  ;;  %vm1996_vm8 = vmor %vm561_vm5, %vm562_vm6 }
  0x8d   : > { %v560_v39 = vadd.f32 %v1937_v35, %v559_v36  ;;  %vm761_vm7 = vweird.f32 %v1952_v51  ;;  %v764_v40 = vand.u32 2147483647, %v1929_v19  ;;  %v766_v63 = vand.u32 2147483648, %v1929_v19 }
  0x8e   : > { %v554_v41 = vsel %vm551_vm4, %v553_v32, %v549_v34  ;;  %v565_v43 = vand.u32 2147483647, %v1914_v53  ;;  %v649_v44 = vsub.f32 1.0, %v648_v27  ;;  %v758_v45 = vmul.f32 %v1952_v51, %v757_v29  ;;  %vm2009_vm9 = vmor %vm760_vm2, %vm761_vm7 }
  0x8f   : > { %v2002_v11 = vpop.eup %1260  ;;  %v480_v46 = vadd.f32 7.5, %v1833_v23  ;;  %v2005_v47 = vadd.f32 11137345.0, %v610_v13  ;;  %v767_v50 = vor.u32 1.1754944e-38, %v766_v63  ;;  %1264 = vrcp.f32 %v1962_v62 }
  0x90   : > { %v2014_v52 = vpop.eup %1262  ;;  %v2016_v53 = vadd.f32 10579290.0, %v508_v28  ;;  %v723_v54 = vadd.f32 10579290.0, %v721_v17  ;;  %v759_v55 = vadd.f32 %v1952_v51, %v758_v45  ;;  %vm765_vm10 = vcmp.eq.f32.partialorder %v764_v40, 8.507059e+37 }
  0x91   : > { %v555_v56 = vmul.f32 %v554_v41, %v509_v38  ;;  %v568_v58 = vor.u32 1.1754944e-38, %v567_v33  ;;  %1266 = vlog2.f32 %v479_v37  ;;  %v663_v19 = vmul.f32 %v1988_v16, %v1948_v48  ;;  %v449_v38 = vld [vmem:[%s350_s30 + $0x8] sm:$0xff] }
  0x92   : > { %v564_v59 = vsel %vm1996_vm8, %v1937_v35, %v560_v39  ;;  %vm566_vm11 = vcmp.eq.f32.partialorder %v565_v43, 8.507059e+37  ;;  %v650_v60 = vmul.f32 %v1955_v57, %v649_v44  ;;  %v763_v61 = vsel %vm2009_vm9, %v1952_v51, %v759_v55 }
  0x93   : > { %1268 = vlog2.f32 %v480_v46  ;;  %v2029_v0 = vadd.f32 7.5, %v1835_v24  ;;  %v720_v1 = vadd.f32 11137345.0, %v718_v15  ;;  %v768_v2 = vsel %vm765_vm10, %v767_v50, %v763_v61 }
  0x94   : > { %v2032_v8 = vadd.f32 7.5, %v1837_v25  ;;  %vm652_vm12 = vweird.f32 %v1933_v21  ;;  %vm653_vm13 = vweird.f32 %v1955_v57  ;;  %v769_v35 = vmul.f32 %v768_v2, %v723_v54 }
  0x95   : > { %v1265_v12 = vpop.eup %1264  ;;  %v2036_v13 = vsel %vm566_vm11, %v568_v58, %v564_v59  ;;  %v613_v51 = vmul.f32 %v611_v26, %v1848_v30  ;;  %v658_v20 = vand.u32 2147483648, %v1933_v21  ;;  %v664_v36 = vsub.f32 1.0, %v663_v19  ;;  %vm2049_vm14 = vmor %vm652_vm12, %vm653_vm13 }
  0x96   : > { %v651_v15 = vadd.f32 %v1955_v57, %v650_v60  ;;  %v656_v27 = vand.u32 2147483647, %v1933_v21  ;;  %v771_v28 = vmul.f32 %v1265_v12, %v1962_v62  ;;  %v2043_v32 = vadd.f32 1.0, %v769_v35  ;;  %v448_v21 = vld [vmem:[%s350_s30] sm:$0xff]  ;;  %s1446_s30 = scalar_lea.hbm %s2241_s5, 32 }
  0x97   : > { %v2045_v33 = vpop.eup %1266  ;;  %v2047_v34 = vadd.f32 1.0, %v555_v56  ;;  %v722_v30 = vmul.f32 %v720_v1, %v1825_v18  ;;  %vm775_vm15 = vweird.f32 %v1962_v62  ;;  %v781_v26 = vand.u32 2147483648, %v1962_v62  ;;  %p1448_p0 = scmp.lt.s32.totalorder %s1446_s30, %s1442_s15 }
  0x98   : > { %v772_v17 = vsub.f32 1.0, %v771_v28  ;;  %vm776_vm0 = vweird.f32 %v1265_v12  ;;  %v779_v29 = vand.u32 2147483647, %v1962_v62  ;;  %1270 = vrcp.f32 %v2043_v32 }
  0x99   : > { %v2062_v39 = vpop.eup %1268  ;;  %v615_v40 = vadd.f32 10579290.0, %v613_v51  ;;  %v659_v63 = vor.u32 1.1754944e-38, %v658_v20  ;;  %v665_v18 = vmul.f32 %v1988_v16, %v664_v36  ;;  %vm667_vm1 = vweird.f32 %v1948_v48  ;;  %vm2074_vm4 = vmor %vm775_vm15, %vm776_vm0  ;;  %p1449_p1 = por %p1448_p0, %p1447_p13 }
  0x9a   : > { %v655_v42 = vsel %vm2049_vm14, %v1955_v57, %v651_v15  ;;  %vm657_vm2 = vcmp.eq.f32.partialorder %v656_v27, 8.507059e+37  ;;  %vm668_vm3 = vweird.f32 %v1988_v16  ;;  %v773_v43 = vmul.f32 %v1265_v12, %v772_v17 }
  0x9b   : > { %v671_v46 = vand.u32 2147483647, %v1948_v48  ;;  %v782_v50 = vor.u32 1.1754944e-38, %v781_v26  ;;  %v673_v54 = vand.u32 2147483648, %v1948_v48  ;;  %v724_v55 = vadd.f32 10579290.0, %v722_v30  ;;  %vm2094_vm6 = vmor %vm667_vm1, %vm668_vm3  ;;  %p1450_p3 = pnand %p1449_p1, %p1445_p11 }
  0x9c   : > { %v774_v57 = vadd.f32 %v1265_v12, %v773_v43  ;;  %vm780_vm5 = vcmp.eq.f32.partialorder %v779_v29, 8.507059e+37  ;;  %v660_v19 = vsel %vm657_vm2, %v659_v63, %v655_v42  ;;  %v666_v59 = vadd.f32 %v1988_v16, %v665_v18 }
  0x9d   : > { %v2083_v62 = vmul.f32 0.6931472, %v2002_v11  ;;  %v2086_v61 = vmul.f32 0.6931472, %v2014_v52  ;;  %v614_v1 = vmul.f32 %v2005_v47, %v1851_v31  ;;  %vm2100_vm7 = vcmp.eq.f32.partialorder %v671_v46, 8.507059e+37 }
  0x9e   : > { %v1271_v60 = vpop.eup %1270  ;;  %v778_v35 = vsel %vm2074_vm4, %v1265_v12, %v774_v57  ;;  %v661_v36 = vmul.f32 %v660_v19, %v615_v40  ;;  %v674_v31 = vor.u32 1.1754944e-38, %v673_v54  ;;  %v670_v48 = vsel %vm2094_vm6, %v1988_v16, %v666_v59 }
  0x9f   : > { %v783_v52 = vsel %vm780_vm5, %v782_v50, %v778_v35  ;;  %v804_v15 = vmul.f32 %v1271_v60, %v2043_v32  ;;  %vm808_vm8 = vweird.f32 %v2043_v32  ;;  %v814_v12 = vand.u32 2147483648, %v2043_v32 }
  0xa0   : > { %v784_v47 = vmul.f32 %v783_v52, %v724_v55  ;;  %vm809_vm9 = vweird.f32 %v1271_v60  ;;  %v570_v37 = vmul.f32 %v2036_v13, %v2016_v53  ;;  %v573_v30 = vadd.f32 0.5, %v1830_v22 }
  0xa1   : > { %v805_v28 = vsub.f32 1.0, %v804_v15  ;;  %v616_v26 = vadd.f32 10579290.0, %v614_v1  ;;  %v675_v16 = vsel %vm2100_vm7, %v674_v31, %v670_v48  ;;  %v576_v29 = vmul.f32 0.6931472, %v2045_v33  ;;  %vm2125_vm10 = vmor %vm808_vm8, %vm809_vm9 }
  0xa2   : > { %v2110_v27 = vadd.f32 1.0, %v784_v47  ;;  %v677_v40 = vadd.f32 1.0, %v661_v36  ;;  %v694_v53 = vadd.f32 7.5, %v1815_v14  ;;  %v815_v18 = vor.u32 1.1754944e-38, %v814_v12 }
  0xa3   : > { %v806_v17 = vmul.f32 %v1271_v60, %v805_v28  ;;  %v572_v43 = vadd.f32 1.0, %v570_v37  ;;  %v676_v33 = vmul.f32 %v675_v16, %v616_v26  ;;  %v574_v49 = vadd.f32 0.5, %v1833_v23  ;;  %v446_v28 = vld [vmem:[%s370_s10 + $0x8] sm:$0xff] }
  0xa4   : > { %v579_v54 = vmul.f32 %v576_v29, %v573_v30  ;;  %vm823_vm12 = vweird.f32 %v2110_v27  ;;  %v827_v35 = vand.u32 2147483647, %v2110_v27  ;;  %v680_v47 = vadd.f32 0.5, %v1837_v25 }
  0xa5   : > { %v807_v63 = vadd.f32 %v1271_v60, %v806_v17  ;;  %vm881_vm0 = vcmp.le.f32.partialorder %v1789_v3, 1e-08  ;;  %vm882_vm1 = vcmp.le.f32.partialorder %v1799_v6, 1e-08 }
  0xa6   : > { %vm828_vm15 = vcmp.eq.f32.partialorder %v827_v35, 8.507059e+37  ;;  %v795_v17 = vadd.f32 -6.5810614, %v579_v54 }
  0xc8   : > { %v453_v41 = vpop.permute.xlu0 %452 }
  0xc9   : > { %v455_v44 = vmul.f32 %v453_v41, %v448_v21  ;;  %v456_v45 = vmul.f32 %v453_v41, %v449_v38  ;;  %v812_v21 = vand.u32 2147483647, %v2043_v32  ;;  %v693_v38 = vadd.f32 7.5, %v1808_v10 }
  0xca   : > { %v811_v32 = vsel %vm2125_vm10, %v1271_v60, %v807_v63 }
  0xcb   : > { %v463_v56 = vadd.f32 %v455_v44, %v1791_v4  ;;  %v464_v58 = vadd.f32 %v456_v45, %v1801_v7  ;;  %v471_v13 = vadd.f32 1e-10, %v455_v44  ;;  %v472_v42 = vadd.f32 1e-10, %v456_v45 }
  0xcc   : > { %vm813_vm11 = vcmp.eq.f32.partialorder %v812_v21, 8.507059e+37  ;;  %v801_v44 = vmul.f32 %v677_v40, %v2047_v34  ;;  %v829_v34 = vand.u32 2147483648, %v2110_v27  ;;  %v788_v40 = vadd.f32 0.5, %v1815_v14 }
  0xcd   : > { %v465_v51 = vadd.f32 1e-10, %v463_v56  ;;  %v466_v11 = vadd.f32 1e-10, %v464_v58  ;;  %v816_v55 = vsel %vm813_vm11, %v815_v18, %v811_v32  ;;  %v678_v56 = vadd.f32 1.0, %v676_v33 }
  0xce   : > { %v679_v58 = vadd.f32 0.5, %v1835_v24  ;;  %v817_v1 = vmul.f32 %v816_v55, %v801_v44  ;;  %v445_v24 = vld [vmem:[%s370_s10] sm:$0xff] }
  0xcf   : > { %1272 = vlog2.f32 %v465_v51  ;;  %v802_v37 = vmul.f32 %v678_v56, %v572_v43 }
  0xd0   : > { %1274 = vlog2.f32 %v466_v11 }
  0xd1   : > { %1276 = vrcp.f32 %v2110_v27 }
  0xd2   : > { %1278 = vlog2.f32 %v2029_v0 }
  0xd3   : > { %1280 = vlog2.f32 %v2032_v8  ;;  %v578_v8 = vmul.f32 0.6931472, %v2062_v39 }
  0xd4   : > { %1282 = vlog2.f32 %v693_v38 }
  0xd5   : > { %v1273_v41 = vpop.eup %1272  ;;  %1284 = vlog2.f32 %v694_v53  ;;  %v580_v11 = vmul.f32 %v578_v8, %v574_v49  ;;  %v852_v53 = vsub.f32 1.0, %v446_v28 }
  0xd6   : > { %v1275_v46 = vpop.eup %1274  ;;  %v2130_v0 = vmul.f32 0.6931472, %v1273_v41  ;;  %1286 = vlog2.f32 %v471_v13 }
  0xd7   : > { %v2135_v50 = vmul.f32 0.6931472, %v1275_v46  ;;  %v1277_v45 = vpop.eup %1276  ;;  %1288 = vlog2.f32 %v472_v42  ;;  %v796_v63 = vadd.f32 -6.5810614, %v580_v11  ;;  %v854_v14 = vadd.f32 1e-10, %v852_v53 }
  0xd8   : > { %v861_v57 = vsub.f32 %v2083_v62, %v2130_v0  ;;  %v1279_v23 = vpop.eup %1278  ;;  %v819_v19 = vmul.f32 %v1277_v45, %v2110_v27  ;;  %vm824_vm13 = vweird.f32 %v1277_v45  ;;  %v839_v32 = vsub.f32 %v2130_v0, %v2083_v62 }
  0xd9   : > { %v1281_v59 = vpop.eup %1280  ;;  %v862_v39 = vsub.f32 %v2086_v61, %v2135_v50  ;;  %v682_v20 = vmul.f32 0.6931472, %v1279_v23  ;;  %vm2159_vm14 = vmor %vm823_vm12, %vm824_vm13 }
  0xda   : > { %v863_v60 = vmul.f32 %v861_v57, %v1791_v4  ;;  %v820_v2 = vsub.f32 1.0, %v819_v19  ;;  %v1283_v51 = vpop.eup %1282  ;;  %v684_v15 = vmul.f32 0.6931472, %v1281_v59  ;;  %v787_v4 = vadd.f32 0.5, %v1808_v10 }
  0xdb   : > { %v864_v52 = vmul.f32 %v862_v39, %v1801_v7  ;;  %v1285_v31 = vpop.eup %1284  ;;  %v830_v7 = vor.u32 1.1754944e-38, %v829_v34  ;;  %v851_v10 = vsub.f32 1.0, %v445_v24  ;;  %v685_v16 = vmul.f32 %v682_v20, %v679_v58 }
  0xdc   : > { %v865_v36 = vmul.f32 1.442695, %v863_v60  ;;  %v821_v48 = vmul.f32 %v1277_v45, %v820_v2  ;;  %v1287_v12 = vpop.eup %1286  ;;  %v790_v38 = vmul.f32 0.6931472, %v1283_v51  ;;  %v686_v29 = vmul.f32 %v684_v15, %v680_v47 }
  0xdd   : > { %v867_v26 = vmul.f32 1.442695, %v864_v52  ;;  %v1289_v21 = vpop.eup %1288  ;;  %v474_v22 = vmul.f32 0.6931472, %v1287_v12  ;;  %v792_v13 = vmul.f32 0.6931472, %v1285_v31  ;;  %v797_v49 = vadd.f32 %v795_v17, %v685_v16 }
  0xde   : > { %1290 = vpow2.f32 %v865_v36  ;;  %v822_v25 = vadd.f32 %v1277_v45, %v821_v48  ;;  %v853_v42 = vadd.f32 1e-10, %v851_v10  ;;  %v476_v33 = vmul.f32 0.6931472, %v1289_v21 }
  0xdf   : > { %1292 = vlog2.f32 %v817_v1  ;;  %v793_v46 = vmul.f32 %v790_v38, %v787_v4  ;;  %v798_v55 = vadd.f32 %v796_v63, %v686_v29  ;;  %v840_v57 = vsub.f32 %v2135_v50, %v2086_v61 }
  0xe0   : > { %1294 = vpow2.f32 %v867_v26  ;;  %v826_v27 = vsel %vm2159_vm14, %v1277_v45, %v822_v25  ;;  %v794_v45 = vmul.f32 %v792_v13, %v788_v40  ;;  %v843_v23 = vsub.f32 %v2083_v62, %v474_v22 }
  0xe1   : > { %v831_v18 = vsel %vm828_vm15, %v830_v7, %v826_v27  ;;  %v799_v19 = vsub.f32 %v797_v49, %v793_v46  ;;  %v841_v34 = vmul.f32 %v839_v32, %v1795_v5  ;;  %v844_v0 = vsub.f32 %v2086_v61, %v476_v33  ;;  %v885_v7 = vld [vmem:[%s1782_s17] sm:$0xff] }
  0xe2   : > { %v832_v41 = vmul.f32 %v831_v18, %v802_v37  ;;  %v800_v1 = vsub.f32 %v798_v55, %v794_v45  ;;  %v842_v2 = vmul.f32 %v840_v57, %v1806_v9  ;;  %v845_v50 = vmul.f32 %v843_v23, %v1789_v3 }
  0xe3   : > { %v846_v11 = vmul.f32 %v844_v0, %v1799_v6 }
  0xe4   : > { %v1291_v43 = vpop.eup %1290  ;;  %1296 = vlog2.f32 %v832_v41  ;;  %v847_v20 = vadd.f32 %v845_v50, %v841_v34 }
  0xe5   : > { %v1293_v8 = vpop.eup %1292  ;;  %v869_v44 = vmul.f32 %v1291_v43, %v851_v10  ;;  %1298 = vlog2.f32 %v853_v42  ;;  %v848_v52 = vadd.f32 %v846_v11, %v842_v2  ;;  %v886_v10 = vld [vmem:[%s1782_s17 + $0x8] sm:$0xff] }
  0xe6   : > { %v1295_v54 = vpop.eup %1294  ;;  %v834_v59 = vmul.f32 0.6931472, %v1293_v8  ;;  %1300 = vlog2.f32 %v854_v14 }
  0xe7   : > { %v870_v56 = vmul.f32 %v1295_v54, %v852_v53  ;;  %v871_v58 = vadd.f32 %v869_v44, %v445_v24 }
  0xe8   : > { %v837_v24 = vadd.f32 %v834_v59, %v799_v19 }
  0xe9   : > { %v872_v39 = vadd.f32 %v870_v56, %v446_v28  ;;  %v873_v60 = vadd.f32 1e-10, %v871_v58 }
  0xea   : > { %v1297_v35 = vpop.eup %1296  ;;  %v849_v31 = vadd.f32 %v847_v20, %v837_v24 }
  0xeb   : > { %v874_v62 = vadd.f32 1e-10, %v872_v39  ;;  %1302 = vlog2.f32 %v873_v60  ;;  %v836_v51 = vmul.f32 0.6931472, %v1297_v35  ;;  %v1299_v5 = vpop.eup %1298 }
  0xec   : > { %v1301_v36 = vpop.eup %1300  ;;  %v856_v47 = vmul.f32 0.6931472, %v1299_v5 }
  0xed   : > { %1304 = vlog2.f32 %v874_v62  ;;  %v838_v61 = vadd.f32 %v836_v51, %v800_v1  ;;  %v858_v4 = vmul.f32 0.6931472, %v1301_v36 }
  0xee   : > { %v859_v28 = vsub.f32 %v849_v31, %v856_v47 }
  0xef   : > { %v850_v15 = vadd.f32 %v848_v52, %v838_v61 }
  0xf1   : > { %v1303_v9 = vpop.eup %1302  ;;  %v860_v26 = vsub.f32 %v850_v15, %v858_v4 }
  0xf2   : > { %v876_v48 = vmul.f32 0.6931472, %v1303_v9 }
  0xf3   : > { %v1305_v12 = vpop.eup %1304 }
  0xf4   : > { %v878_v37 = vmul.f32 0.6931472, %v1305_v12  ;;  %v879_v30 = vsub.f32 0.0, %v876_v48 }
  0xf6   : > { %v880_v21 = vsub.f32 0.0, %v878_v37  ;;  %v883_v25 = vsel %vm881_vm0, %v879_v30, %v859_v28 }
  0xf7   : > { %v887_v3 = vadd.f32 %v885_v7, %v883_v25 }
  0xf8   : > { %v884_v16 = vsel %vm882_vm1, %v880_v21, %v860_v26 }
  0xf9   : > { %v888_v38 = vadd.f32 %v886_v10, %v884_v16  ;;  %889 = vst [vmem:[%s1782_s17] sm:$0xff] %v887_v3 }
  0xfb   : > { %890 = vst [vmem:[%s1782_s17 + $0x8] sm:$0xff] %v888_v38 }
  0xfc   : > { %1453 = shalt.err (!%p1450_p3)
}
  0xfd   : > { %1138 = dma.vmem_to_hbm [thread:$0]  (%p1687_p12), %s906_s1, 256, %s908_s20, %s892_s21  }
  0xfe PF: > { %s2296_s10 = sld [smem:[#allocation20_spill]] }
  0xff   : > { %s2297_s29 = sld [smem:[#allocation15_spill]] }
 0x104   : > { %p1158_p4 = scmp.ge.s32.totalorder %s2296_s10, 2 }
 0x105   : > { %s919_s9 = sand.u32 1, %s2297_s29  }
 0x106   : > { %p1154_p5 = pnand %p1158_p4, %p1699_p2  ;;  %s920_s11 = scalar_lea.sflag [#allocation4], %s919_s9 }
 0x108   : > { %p1155_p6 = pneg %p1154_p5 }
 0x10a   : > { %1511 = dma.done.wait (%p1155_p6), %s920_s11, 256  }
 0x10b   : > { %1513 = vsyncadd (%p1155_p6), %s920_s11, 4294967040  ;;  %s27_s28 = sadd.s32 1, %s2296_s10   ;;  %s2299_s16 = sld [smem:[#allocation16_spill]] }
 0x10c   : > { %p24_p8 = scmp.ge.s32.totalorder %s27_s28, 10   ;;  %s2300_s20 = sld [smem:[#allocation23_spill]] }
 0x10d   : > { %s2301_s23 = sld [smem:[#allocation17_spill]]  ;;  %s2307_s18 = smov %s1520_s19 }
 0x10e   : > { %s2302_s8 = sld [smem:[#allocation24_spill]]  ;;  %s2309_s21 = smov %s1532_s22 }
 0x10f   : > { %s2303_s24 = sld [smem:[#allocation18_spill]] }
 0x110   : > { %s2304_s25 = sld [smem:[#allocation19_spill]]  ;;  %26 = sbr.rel (!%p24_p8) target bundleno = 16 (0x10), region = 129 }
 0x111   : > { %s2305_s26 = sld [smem:[#allocation21_spill]]  ;;  %s2308_s19 = smov %s2299_s16 }
 0x112   : > { %s2306_s27 = sld [smem:[#allocation22_spill]] }
 0x113   : > { %s2310_s22 = smov %s2301_s23 }
 0x114   : > { %s2311_s23 = smov %s2302_s8 }
 0x115   :  { %926 = vsyncpa [#allocation3], 1 }
 0x116   :  { %928 = vsyncpa [#allocation3 + $0x1], 1 }
 0x117   :  { %929 = vsyncpa [#allocation6], 1 }
 0x118   :  { %931 = vsyncpa [#allocation6 + $0x1], 1 }
 0x119   :  { %932 = vsyncpa [#allocation9], 1 }
 0x11a   :  { %934 = vsyncpa [#allocation9 + $0x1], 1 }
 0x11b   :  { %935 = vsyncpa [#allocation4], 1 }
 0x11c   :  { %937 = vsyncpa [#allocation4 + $0x1], 1 }

</bundles_post_ra>
